<compile_context>
chip_gen: v7x
topology: tpu7x:2x2x1
jax: 0.10.0
libtpu: 0.0.40
codegen_flags: <defaults>
</compile_context>

<pallas_src>
import jax
import jax.numpy as jnp
from jax.experimental import pallas as pl
from jax.experimental.pallas import tpu as pltpu


def _round_up(x, m):
    return ((x + m - 1) // m) * m


def _make_align_kernel(num_mods, use_bf16_mxu):
    """One grid step: (tb, nin) x-tiles for all M modalities against a resident
    (nin, tn) weight tile.  Per-modality ReLU outputs + running mean."""

    def kernel(*refs):
        x_refs = refs[:num_mods]
        w_ref = refs[num_mods]
        b_ref = refs[num_mods + 1]
        per_refs = refs[num_mods + 2: 2 * num_mods + 2]
        mean_ref = refs[2 * num_mods + 2]
        acc_ref = refs[2 * num_mods + 3]          # VMEM f32 accumulator scratch

        w = w_ref[...]
        b = b_ref[...]
        if use_bf16_mxu:
            w = w.astype(jnp.bfloat16)
            dot_kwargs = dict(preferred_element_type=jnp.float32)
        else:
            dot_kwargs = dict(preferred_element_type=jnp.float32,
                              precision=jax.lax.Precision.HIGHEST)

        # M is tiny: static unroll; only one modality's result is live at a time.
        for i in range(num_mods):
            x = x_refs[i][...]
            if use_bf16_mxu:
                x = x.astype(jnp.bfloat16)
            y = jnp.dot(x, w, **dot_kwargs) + b      # bias [1, tn] broadcasts
            y = jnp.maximum(y, 0.0)                  # ReLU (dropout = identity in eval)
            # TODO(synk): training-mode dropout (stochastic masking) not implemented.
            per_refs[i][...] = y.astype(per_refs[i].dtype)
            if i == 0:
                acc_ref[...] = y
            else:
                acc_ref[...] += y

        mean_ref[...] = (acc_ref[...] * (1.0 / num_mods)).astype(mean_ref.dtype)

    return kernel


def align_forward(latent_emb_mod, weight_t, bias, *,
                  block_b=256, block_n=512, use_bf16_mxu=False):
    """latent_emb_mod: dict[str, [B, nin]]; weight_t: [nin, nout]; bias: [nout]."""
    mods = list(latent_emb_mod.keys())
    xs = [latent_emb_mod[m] for m in mods]           # M separate inputs: no stack copy
    M = len(mods)
    B, nin = xs[0].shape
    nout = weight_t.shape[1]
    dtype = xs[0].dtype
    itemsize = jnp.dtype(dtype).itemsize

    # --- Tile / pad geometry -------------------------------------------------
    sub = 16 if dtype == jnp.bfloat16 else 8          # sublane alignment
    tb = _round_up(min(block_b, _round_up(B, sub)), sub)
    B_p = _round_up(B, tb)
    tn = _round_up(min(block_n, _round_up(nout, 128)), 128)  # lane-dense output
    nout_p = _round_up(nout, tn)

    xs_p = [x if B_p == B else jnp.pad(x, ((0, B_p - B), (0, 0))) for x in xs]
    w_p = weight_t if nout_p == nout else jnp.pad(weight_t, ((0, 0), (0, nout_p - nout)))
    b2 = bias.reshape(1, nout)
    b_p = b2 if nout_p == nout else jnp.pad(b2, ((0, 0), (0, nout_p - nout)))

    grid = (B_p // tb, nout_p // tn)

    # --- VMEM budget (explicit for v5e's 16 MiB scoped default) --------------
    per_block_in = (M * tb * nin + nin * tn + tn) * itemsize
    per_block_out = (M + 1) * tb * tn * itemsize
    scratch_bytes = tb * tn * 4
    vmem_limit = min(max(2 * (per_block_in + per_block_out) + scratch_bytes
                         + (4 << 20), 16 << 20), 64 << 20)

    cost = pl.CostEstimate(
        flops=2 * M * B_p * nin * nout_p,
        transcendentals=0,
        bytes_accessed=(M * B_p * nin + nin * nout_p + nout_p
                        + (M + 1) * B_p * nout_p) * itemsize,
    )

    in_specs = (
        [pl.BlockSpec((tb, nin), lambda i, j: (i, 0)) for _ in range(M)]
        + [pl.BlockSpec((nin, tn), lambda i, j: (0, j)),   # weight: resident over i
           pl.BlockSpec((1, tn), lambda i, j: (0, j))]     # bias:   resident over i
    )
    out_specs = [pl.BlockSpec((tb, tn), lambda i, j: (i, j)) for _ in range(M + 1)]

    outs = pl.pallas_call(
        _make_align_kernel(M, use_bf16_mxu),
        out_shape=tuple(jax.ShapeDtypeStruct((B_p, nout_p), dtype)
                        for _ in range(M + 1)),
        grid_spec=pltpu.PrefetchScalarGridSpec(
            num_scalar_prefetch=0,
            grid=grid,
            in_specs=in_specs,
            out_specs=out_specs,
            scratch_shapes=[pltpu.VMEM((tb, tn), jnp.float32)],
        ),
        compiler_params=pltpu.CompilerParams(
            dimension_semantics=("parallel", "parallel"),
            vmem_limit_bytes=vmem_limit,
        ),
        cost_estimate=cost,
    )(*xs_p, w_p, b_p)

    per_outs, mean_p = outs[:M], outs[M]
    align_mod = {m: per_outs[i][:B, :nout] for i, m in enumerate(mods)}
    align_emb = mean_p[:B, :nout]
    return align_emb, align_mod


if __name__ == "__main__":
    key = jax.random.PRNGKey(0)
    B, nin, nout = 8, 32, 32
    mods = ["rna", "atac", "protein"]

    k_w, k_b, *k_x = jax.random.split(key, 2 + len(mods))
    # Deterministic parameter init (PyTorch Linear-style uniform bounds).
    bound = 1.0 / (nin ** 0.5)
    weight_t = jax.random.uniform(k_w, (nin, nout), jnp.float32, -bound, bound)
    bias = jax.random.uniform(k_b, (nout,), jnp.float32, -bound, bound)

    latent_emb_mod = {
        m: jax.random.normal(k, (B, nin), jnp.float32) for m, k in zip(mods, k_x)
    }

    align_emb, align_mod = align_forward(latent_emb_mod, weight_t, bias)
    jax.block_until_ready(align_emb)
    jax.block_until_ready(align_mod)

    # Reference check in plain JAX (eval-mode dropout == identity).
    ref_mod = {
        m: jnp.maximum(
            jnp.dot(latent_emb_mod[m], weight_t,
                    precision=jax.lax.Precision.HIGHEST) + bias, 0.0)
        for m in mods
    }
    ref_emb = jnp.mean(jnp.stack([ref_mod[m] for m in mods], 0), axis=0)
    assert jnp.allclose(align_emb, ref_emb, atol=1e-5)
    for m in mods:
        assert jnp.allclose(align_mod[m], ref_mod[m], atol=1e-5)

    print("KERNEL_OK")
</pallas_src>

<mosaic_0001>
module attributes {stable_mosaic.version = 11 : i64} {
  func.func @kernel(%arg0: i32, %arg1: i32, %arg2: memref<8x32xf32, #tpu.memory_space<vmem>>, %arg3: memref<8x32xf32, #tpu.memory_space<vmem>>, %arg4: memref<8x32xf32, #tpu.memory_space<vmem>>, %arg5: memref<32x128xf32, #tpu.memory_space<vmem>>, %arg6: memref<1x128xf32, #tpu.memory_space<vmem>>, %arg7: memref<8x128xf32, #tpu.memory_space<vmem>>, %arg8: memref<8x128xf32, #tpu.memory_space<vmem>>, %arg9: memref<8x128xf32, #tpu.memory_space<vmem>>, %arg10: memref<8x128xf32, #tpu.memory_space<vmem>>, %arg11: memref<8x128xf32, #tpu.memory_space<vmem>>) attributes {dimension_semantics = [#tpu.dimension_semantics<parallel>, #tpu.dimension_semantics<parallel>], iteration_bounds = array<i64: 1, 1>, scalar_prefetch = 0 : i64, scratch_operands = 1 : i64, tpu.core_type = #tpu.core_type<tc>, window_params = [{transform_indices = @transform_0, window_bounds = array<i64: 8, 32>}, {transform_indices = @transform_1, window_bounds = array<i64: 8, 32>}, {transform_indices = @transform_2, window_bounds = array<i64: 8, 32>}, {transform_indices = @transform_3, window_bounds = array<i64: 32, 128>}, {transform_indices = @transform_4, window_bounds = array<i64: 1, 128>}, {transform_indices = @transform_5, window_bounds = array<i64: 8, 128>}, {transform_indices = @transform_6, window_bounds = array<i64: 8, 128>}, {transform_indices = @transform_7, window_bounds = array<i64: 8, 128>}, {transform_indices = @transform_8, window_bounds = array<i64: 8, 128>}]} {
    %c0 = arith.constant 0 : index
    %c0_0 = arith.constant 0 : index
    %0 = vector.load %arg5[%c0, %c0_0] : memref<32x128xf32, #tpu.memory_space<vmem>>, vector<32x128xf32>
    %c0_1 = arith.constant 0 : index
    %c0_2 = arith.constant 0 : index
    %1 = vector.load %arg6[%c0_1, %c0_2] : memref<1x128xf32, #tpu.memory_space<vmem>>, vector<1x128xf32>
    %c0_3 = arith.constant 0 : index
    %c0_4 = arith.constant 0 : index
    %2 = vector.load %arg2[%c0_3, %c0_4] : memref<8x32xf32, #tpu.memory_space<vmem>>, vector<8x32xf32>
    %cst = arith.constant dense<0.000000e+00> : vector<8x128xf32>
    %3 = tpu.matmul %2, %0, %cst {dimension_numbers = #tpu.dot_dimension_numbers<[1], [0], [0], [1], [0, 0, 1, 1], [], []>, precision = #tpu.contract_precision<fp32>} : vector<8x32xf32>, vector<32x128xf32>, vector<8x128xf32> -> vector<8x128xf32>
    %4 = vector.broadcast %1 : vector<1x128xf32> to vector<8x128xf32>
    %5 = arith.addf %3, %4 : vector<8x128xf32>
    %cst_5 = arith.constant 0.000000e+00 : f32
    %6 = vector.broadcast %cst_5 : f32 to vector<8x128xf32>
    %7 = arith.maximumf %5, %6 : vector<8x128xf32>
    %c0_6 = arith.constant 0 : index
    %c0_7 = arith.constant 0 : index
    %8 = vector.load %arg7[%c0_6, %c0_7] : memref<8x128xf32, #tpu.memory_space<vmem>>, vector<8x128xf32>
    tpu.vector_store %arg7[%c0_6, %c0_7], %7 {strides = array<i32>} : memref<8x128xf32, #tpu.memory_space<vmem>>, vector<8x128xf32>,
    %c0_8 = arith.constant 0 : index
    %c0_9 = arith.constant 0 : index
    %9 = vector.load %arg11[%c0_8, %c0_9] : memref<8x128xf32, #tpu.memory_space<vmem>>, vector<8x128xf32>
    tpu.vector_store %arg11[%c0_8, %c0_9], %7 {strides = array<i32>} : memref<8x128xf32, #tpu.memory_space<vmem>>, vector<8x128xf32>,
    %c0_10 = arith.constant 0 : index
    %c0_11 = arith.constant 0 : index
    %10 = vector.load %arg3[%c0_10, %c0_11] : memref<8x32xf32, #tpu.memory_space<vmem>>, vector<8x32xf32>
    %cst_12 = arith.constant dense<0.000000e+00> : vector<8x128xf32>
    %11 = tpu.matmul %10, %0, %cst_12 {dimension_numbers = #tpu.dot_dimension_numbers<[1], [0], [0], [1], [0, 0, 1, 1], [], []>, precision = #tpu.contract_precision<fp32>} : vector<8x32xf32>, vector<32x128xf32>, vector<8x128xf32> -> vector<8x128xf32>
    %12 = vector.broadcast %1 : vector<1x128xf32> to vector<8x128xf32>
    %13 = arith.addf %11, %12 : vector<8x128xf32>
    %cst_13 = arith.constant 0.000000e+00 : f32
    %14 = vector.broadcast %cst_13 : f32 to vector<8x128xf32>
    %15 = arith.maximumf %13, %14 : vector<8x128xf32>
    %c0_14 = arith.constant 0 : index
    %c0_15 = arith.constant 0 : index
    %16 = vector.load %arg8[%c0_14, %c0_15] : memref<8x128xf32, #tpu.memory_space<vmem>>, vector<8x128xf32>
    tpu.vector_store %arg8[%c0_14, %c0_15], %15 {strides = array<i32>} : memref<8x128xf32, #tpu.memory_space<vmem>>, vector<8x128xf32>,
    %c0_16 = arith.constant 0 : index
    %c0_17 = arith.constant 0 : index
    %17 = vector.load %arg11[%c0_16, %c0_17] : memref<8x128xf32, #tpu.memory_space<vmem>>, vector<8x128xf32>
    %18 = arith.addf %17, %15 : vector<8x128xf32>
    %c0_18 = arith.constant 0 : index
    %c0_19 = arith.constant 0 : index
    %19 = vector.load %arg11[%c0_18, %c0_19] : memref<8x128xf32, #tpu.memory_space<vmem>>, vector<8x128xf32>
    tpu.vector_store %arg11[%c0_18, %c0_19], %18 {strides = array<i32>} : memref<8x128xf32, #tpu.memory_space<vmem>>, vector<8x128xf32>,
    %c0_20 = arith.constant 0 : index
    %c0_21 = arith.constant 0 : index
    %20 = vector.load %arg4[%c0_20, %c0_21] : memref<8x32xf32, #tpu.memory_space<vmem>>, vector<8x32xf32>
    %cst_22 = arith.constant dense<0.000000e+00> : vector<8x128xf32>
    %21 = tpu.matmul %20, %0, %cst_22 {dimension_numbers = #tpu.dot_dimension_numbers<[1], [0], [0], [1], [0, 0, 1, 1], [], []>, precision = #tpu.contract_precision<fp32>} : vector<8x32xf32>, vector<32x128xf32>, vector<8x128xf32> -> vector<8x128xf32>
    %22 = vector.broadcast %1 : vector<1x128xf32> to vector<8x128xf32>
    %23 = arith.addf %21, %22 : vector<8x128xf32>
    %cst_23 = arith.constant 0.000000e+00 : f32
    %24 = vector.broadcast %cst_23 : f32 to vector<8x128xf32>
    %25 = arith.maximumf %23, %24 : vector<8x128xf32>
    %c0_24 = arith.constant 0 : index
    %c0_25 = arith.constant 0 : index
    %26 = vector.load %arg9[%c0_24, %c0_25] : memref<8x128xf32, #tpu.memory_space<vmem>>, vector<8x128xf32>
    tpu.vector_store %arg9[%c0_24, %c0_25], %25 {strides = array<i32>} : memref<8x128xf32, #tpu.memory_space<vmem>>, vector<8x128xf32>,
    %c0_26 = arith.constant 0 : index
    %c0_27 = arith.constant 0 : index
    %27 = vector.load %arg11[%c0_26, %c0_27] : memref<8x128xf32, #tpu.memory_space<vmem>>, vector<8x128xf32>
    %28 = arith.addf %27, %25 : vector<8x128xf32>
    %c0_28 = arith.constant 0 : index
    %c0_29 = arith.constant 0 : index
    %29 = vector.load %arg11[%c0_28, %c0_29] : memref<8x128xf32, #tpu.memory_space<vmem>>, vector<8x128xf32>
    tpu.vector_store %arg11[%c0_28, %c0_29], %28 {strides = array<i32>} : memref<8x128xf32, #tpu.memory_space<vmem>>, vector<8x128xf32>,
    %c0_30 = arith.constant 0 : index
    %c0_31 = arith.constant 0 : index
    %30 = vector.load %arg11[%c0_30, %c0_31] : memref<8x128xf32, #tpu.memory_space<vmem>>, vector<8x128xf32>
    %cst_32 = arith.constant 0.333333343 : f32
    %31 = vector.broadcast %cst_32 : f32 to vector<8x128xf32>
    %32 = arith.mulf %30, %31 : vector<8x128xf32>
    %c0_33 = arith.constant 0 : index
    %c0_34 = arith.constant 0 : index
    %33 = vector.load %arg10[%c0_33, %c0_34] : memref<8x128xf32, #tpu.memory_space<vmem>>, vector<8x128xf32>
    tpu.vector_store %arg10[%c0_33, %c0_34], %32 {strides = array<i32>} : memref<8x128xf32, #tpu.memory_space<vmem>>, vector<8x128xf32>,
    return
  }
  func.func @transform_0(%arg0: i32, %arg1: i32) -> (i32, i32) {
    %c0_i32 = arith.constant 0 : i32
    %c0_i32_0 = arith.constant 0 : i32
    return %arg0, %c0_i32 : i32, i32
  }
  func.func @transform_1(%arg0: i32, %arg1: i32) -> (i32, i32) {
    %c0_i32 = arith.constant 0 : i32
    %c0_i32_0 = arith.constant 0 : i32
    return %arg0, %c0_i32 : i32, i32
  }
  func.func @transform_2(%arg0: i32, %arg1: i32) -> (i32, i32) {
    %c0_i32 = arith.constant 0 : i32
    %c0_i32_0 = arith.constant 0 : i32
    return %arg0, %c0_i32 : i32, i32
  }
  func.func @transform_3(%arg0: i32, %arg1: i32) -> (i32, i32) {
    %c0_i32 = arith.constant 0 : i32
    %c0_i32_0 = arith.constant 0 : i32
    return %c0_i32, %arg1 : i32, i32
  }
  func.func @transform_4(%arg0: i32, %arg1: i32) -> (i32, i32) {
    %c0_i32 = arith.constant 0 : i32
    %c0_i32_0 = arith.constant 0 : i32
    return %c0_i32, %arg1 : i32, i32
  }
  func.func @transform_5(%arg0: i32, %arg1: i32) -> (i32, i32) {
    %c0_i32 = arith.constant 0 : i32
    return %arg0, %arg1 : i32, i32
  }
  func.func @transform_6(%arg0: i32, %arg1: i32) -> (i32, i32) {
    %c0_i32 = arith.constant 0 : i32
    return %arg0, %arg1 : i32, i32
  }
  func.func @transform_7(%arg0: i32, %arg1: i32) -> (i32, i32) {
    %c0_i32 = arith.constant 0 : i32
    return %arg0, %arg1 : i32, i32
  }
  func.func @transform_8(%arg0: i32, %arg1: i32) -> (i32, i32) {
    %c0_i32 = arith.constant 0 : i32
    return %arg0, %arg1 : i32, i32
  }
}

</mosaic_0001>

<bundles_post_ra>
// kernel: tpu_custom_call.1
= control target key start
LH: loop header
LB: loop body
LE: loop exit
PB: predicated region body
PF: predicated region fallthrough
CT: control target
= control target key end

     0   :  { %14 = vsyncpa [#allocation4], 0  ;;  %s2570_s0 = inlined_call_operand.hbm [shape: f32[8,32], index: 0, kind: input, shape index: {}]   ;;  %s2571_s1 = inlined_call_operand.hbm [shape: f32[8,32], index: 1, kind: input, shape index: {}]   ;;  %s2572_s2 = inlined_call_operand.hbm [shape: f32[8,32], index: 2, kind: input, shape index: {}]   ;;  %s2573_s3 = inlined_call_operand.hbm [shape: f32[32,128], index: 3, kind: input, shape index: {}]   ;;  %s2574_s4 = inlined_call_operand.vmem [shape: f32[1,128], index: 4, kind: input, shape index: {}]   ;;  %s2575_s5 = inlined_call_operand.hbm [shape: f32[8,128], index: 5, kind: output, shape index: {0}]   ;;  %s2576_s6 = inlined_call_operand.hbm [shape: f32[8,128], index: 6, kind: output, shape index: {1}]   ;;  %s2577_s7 = inlined_call_operand.hbm [shape: f32[8,128], index: 7, kind: output, shape index: {2}]   ;;  %s2578_s8 = inlined_call_operand.hbm [shape: f32[8,128], index: 8, kind: output, shape index: {3}]  }
   0x1   :  { %15 = vsyncpa [#allocation7], 0 }
   0x2   :  { %16 = vsyncpa [#allocation10], 0 }
   0x3   :  { %17 = vsyncpa [#allocation5], 0 }
   0x4   :  { %18 = vsyncpa [#allocation13], 0 }
   0x5   :  { %19 = vsyncpa [#allocation16], 0  ;;  %s2259_s27 = smov [#allocation6]   ;;  %s2260_s29 = smov [#allocation3]  }
   0x6   :  { %s36_s28 = sshll.u32 %s2259_s27, 4  ;;  %s26_s30 = sshll.u32 %s2260_s29, 4  ;;  %s37_s28 = int_to_ptr.vmem [resolvable:$true] %s36_s28  ;;  %s27_s30 = int_to_ptr.vmem [resolvable:$true] %s26_s30 }
   0x7   :  { %s2071_s11 = scalar_lea.hbm %s2571_s1, 128 }
   0x8   :  { %p2072_p0 = scmp.ne.s32.totalorder %s2571_s1, %s2071_s11  ;;  %p2075_p1 = scmp.lt.u32.totalorder %s2071_s11, %s2571_s1 }
   0xa   :  { %p2077_p2 = pnand %p2075_p1, %p2072_p0 }
   0xc   :  { %2080 = shalt.err (!%p2077_p2)
}
   0xd   :  { %s2081_s16 = scalar_lea.vmem %s37_s28, 128  ;;  %p2086_p4 = scmp.lt.s32.totalorder %s37_s28, %s37_s28 }
   0xe   :  { %p2082_p3 = scmp.ne.s32.totalorder %s37_s28, %s2081_s16  ;;  %p2087_p5 = scmp.lt.s32.totalorder %s2081_s16, %s2081_s16 }
  0x10   :  { %p2088_p6 = por %p2087_p5, %p2086_p4 }
  0x12   :  { %p2089_p7 = pnand %p2088_p6, %p2082_p3 }
  0x14   :  { %2092 = shalt.err (!%p2089_p7)
}
  0x15   :  { %39 = dma.hbm_to_vmem [thread:$0]  %s2571_s1, 128, %s37_s28, [#allocation7]  }
  0x16   :  { %s2093_s21 = scalar_lea.hbm %s2570_s0, 128 }
  0x17   :  { %p2094_p8 = scmp.ne.s32.totalorder %s2570_s0, %s2093_s21  ;;  %p2097_p9 = scmp.lt.u32.totalorder %s2093_s21, %s2570_s0 }
  0x19   :  { %p2099_p10 = pnand %p2097_p9, %p2094_p8 }
  0x1b   :  { %2102 = shalt.err (!%p2099_p10)
}
  0x1c   :  { %s2103_s26 = scalar_lea.vmem %s27_s30, 128  ;;  %p2108_p12 = scmp.lt.s32.totalorder %s27_s30, %s27_s30 }
  0x1d   :  { %p2104_p11 = scmp.ne.s32.totalorder %s27_s30, %s2103_s26  ;;  %p2109_p13 = scmp.lt.s32.totalorder %s2103_s26, %s2103_s26 }
  0x1f   :  { %p2110_p0 = por %p2109_p13, %p2108_p12 }
  0x21   :  { %p2111_p1 = pnand %p2110_p0, %p2104_p11 }
  0x23   :  { %2114 = shalt.err (!%p2111_p1)
}
  0x24   :  { %29 = dma.hbm_to_vmem [thread:$0]  %s2570_s0, 128, %s27_s30, [#allocation4]  }
  0x25   :  { %s2261_s28 = smov [#allocation8]   ;;  %s2262_s9 = smov [#allocation9]  }
  0x26   :  { %s46_s29 = sshll.u32 %s2261_s28, 4  ;;  %s55_s10 = sshll.u32 %s2262_s9, 4  ;;  %s47_s29 = int_to_ptr.vmem [resolvable:$true] %s46_s29  ;;  %s2341_s10 = int_to_ptr.vmem [resolvable:$true] %s55_s10 }
  0x27   :  { %s2115_s13 = scalar_lea.hbm %s2572_s2, 128 }
  0x28   :  { %p2116_p2 = scmp.ne.s32.totalorder %s2572_s2, %s2115_s13  ;;  %p2119_p3 = scmp.lt.u32.totalorder %s2115_s13, %s2572_s2 }
  0x2a   :  { %p2121_p4 = pnand %p2119_p3, %p2116_p2 }
  0x2c   :  { %2124 = shalt.err (!%p2121_p4)
}
  0x2d   :  { %s2125_s0 = scalar_lea.vmem %s47_s29, 128  ;;  %p2130_p6 = scmp.lt.s32.totalorder %s47_s29, %s47_s29 }
  0x2e   :  { %p2126_p5 = scmp.ne.s32.totalorder %s47_s29, %s2125_s0  ;;  %p2131_p7 = scmp.lt.s32.totalorder %s2125_s0, %s2125_s0 }
  0x30   :  { %p2132_p8 = por %p2131_p7, %p2130_p6 }
  0x32   :  { %p2133_p9 = pnand %p2132_p8, %p2126_p5 }
  0x34   :  { %2136 = shalt.err (!%p2133_p9)
}
  0x35   :  { %49 = dma.hbm_to_vmem [thread:$0]  %s2572_s2, 128, %s47_s29, [#allocation7]  }
  0x36   :  { %s2137_s21 = scalar_lea.hbm %s2573_s3, 512 }
  0x37   :  { %p2138_p10 = scmp.ne.s32.totalorder %s2573_s3, %s2137_s21  ;;  %p2141_p11 = scmp.lt.u32.totalorder %s2137_s21, %s2573_s3 }
  0x39   :  { %p2143_p12 = pnand %p2141_p11, %p2138_p10 }
  0x3b   :  { %2146 = shalt.err (!%p2143_p12)
}
  0x3c   :  { %s2147_s26 = scalar_lea.vmem %s2341_s10, 512  ;;  %p2152_p0 = scmp.lt.s32.totalorder %s2341_s10, %s2341_s10 }
  0x3d   :  { %p2148_p13 = scmp.ne.s32.totalorder %s2341_s10, %s2147_s26  ;;  %p2153_p1 = scmp.lt.s32.totalorder %s2147_s26, %s2147_s26 }
  0x3f   :  { %p2154_p2 = por %p2153_p1, %p2152_p0 }
  0x41   :  { %p2155_p3 = pnand %p2154_p2, %p2148_p13 }
  0x43   :  { %2158 = shalt.err (!%p2155_p3)
}
  0x44   :  { %s2263_s2 = smov 128   ;;  %s2264_s1 = smov 8  }
  0x45   :  { %61 = dma.hbm_to_vmem [thread:$0]  %s2573_s3, 512, %s2341_s10, [#allocation10], %s2263_s2, %s2263_s2, %s2264_s1  }
  0x46   :  { %2247 = dma.done.wait [#allocation4], 128  }
  0x47   :  { %2248 = vsyncadd [#allocation4], 4294967168 }
  0x48   :  { %2249 = dma.done.wait [#allocation7], 256  }
  0x49   :  { %2250 = vsyncadd [#allocation7], 4294967040 }
  0x4a   :  { %2251 = dma.done.wait [#allocation10], 512  }
  0x4b   :  { %2252 = vsyncadd [#allocation10], 4294966784  ;;  %v2265_v0 = vmov 0.0|0.0   ;;  %vm2266_vm0 = vmmov 0   ;;  %v2267_v1 = vmov 0.0   ;;  %vm88_vm1 = vcmask 261120  }
  0x4c   :  { %1918 = vmatprep.subr.bf16.mxu1 %v2265_v0  ;;  %1936 = vmatprep.subr.bf16.mxu0 %v2265_v0  ;;  %v76_v2 = vld [vmem:[#allocation9] sm:$0xff]  ;;  %v77_v3 = vld [vmem:[#allocation9 + $0x8] sm:$0xff]  ;;  %v78_v4 = vld [vmem:[#allocation9 + $0x10] sm:$0xff]  ;;  %s2268_s9 = smov [#allocation11]  }
  0x4d   :  { %1728 = vmatprep.mubr.msk.f32.mxu1 %vm2266_vm0, %v2267_v1  ;;  %1761 = vmatprep.mubr.msk.f32.mxu0 %vm2266_vm0, %v2267_v1  ;;  %v93_v5 = vand.u32 4294901760, %v76_v2  ;;  %v96_v6 = vand.u32 4294901760, %v77_v3  ;;  %v79_v7 = vld [vmem:[#allocation9 + $0x18] sm:$0xff]  ;;  %v99_v8 = vand.u32 4294901760, %v78_v4  ;;  %v81_v9 = vld [vmem:[#allocation3] sm:$0xff]  ;;  %v580_v38 = vld [vmem:[#allocation6] sm:$0xff] }
  0x4e   :  { %v102_v10 = vand.u32 4294901760, %v79_v7  ;;  %v90_v11 = vsel %vm88_vm1, %v81_v9, 0  ;;  %v1074_v35 = vld [vmem:[#allocation8] sm:$0xff]  ;;  %v582_v42 = vsel %vm88_vm1, %v580_v38, 0  ;;  %v1629_v55 = vld [vmem:[%s2574_s4] ss:$0 sm:$0xff] }
  0x4f   :  { %v2379_v12 = vpack.c.bf16 %v96_v6, %v93_v5  ;;  %v2381_v13 = vand.u32 4294901760, %v90_v11  ;;  %v173_v14 = vsub.f32 %v76_v2, %v93_v5  ;;  %v180_v15 = vsub.f32 %v77_v3, %v96_v6  ;;  %s1577_s10 = sshll.u32 %s2268_s9, 4  ;;  %s1578_s10 = int_to_ptr.vmem [resolvable:$true] %s1577_s10 }
  0x50   :  { %v187_v16 = vsub.f32 %v78_v4, %v99_v8  ;;  %v194_v17 = vsub.f32 %v79_v7, %v102_v10  ;;  %v2385_v18 = vpack.c.bf16 %v102_v10, %v99_v8  ;;  %v1076_v40 = vsel %vm88_vm1, %v1074_v35, 0  ;;  %s2159_s11 = scalar_lea.vmem %s1578_s10, 128  ;;  %p2164_p5 = scmp.lt.s32.totalorder %s1578_s10, %s1578_s10 }
  0x51   :  { %1920 = vmatpush3.bf16.msra.mxu1 %v2379_v12  ;;  %1938 = vmatpush3.bf16.msra.mxu0 %v2379_v12  ;;  %v2388_v19 = vsub.f32 %v90_v11, %v2381_v13  ;;  %v174_v20 = vand.u32 4294901760, %v173_v14  ;;  %v181_v21 = vand.u32 4294901760, %v180_v15  ;;  %v2411_v43 = vand.u32 4294901760, %v1076_v40  ;;  %p2160_p4 = scmp.ne.s32.totalorder %s1578_s10, %s2159_s11  ;;  %p2165_p6 = scmp.lt.s32.totalorder %s2159_s11, %s2159_s11 }
  0x52   :  { %1921 = vmatprep.subr.bf16.mxu1 %v2265_v0  ;;  %1939 = vmatprep.subr.bf16.mxu0 %v2265_v0  ;;  %v188_v22 = vand.u32 4294901760, %v187_v16  ;;  %v195_v23 = vand.u32 4294901760, %v194_v17  ;;  %v2414_v44 = vand.u32 4294901760, %v582_v42  ;;  %v1931_v45 = vpack.c.bf16 %v180_v15, %v173_v14 }
  0x53   :  { %v163_v24 = vand.u32 4294901760, %v2388_v19  ;;  %v175_v25 = vsub.f32 %v173_v14, %v174_v20  ;;  %v182_v26 = vsub.f32 %v180_v15, %v181_v21  ;;  %v2396_v32 = vpack.c.bf16 %v181_v21, %v174_v20  ;;  %p2166_p7 = por %p2165_p6, %p2164_p5 }
  0x54   :  { %v189_v27 = vsub.f32 %v187_v16, %v188_v22  ;;  %v196_v28 = vsub.f32 %v194_v17, %v195_v23  ;;  %v2401_v39 = vpack.c.bf16 %v195_v23, %v188_v22  ;;  %v2420_v46 = vsub.f32 %v1076_v40, %v2411_v43 }
  0x55   :  { %1923 = vmatpush3.bf16.msra.mxu1 %v2385_v18  ;;  %1941 = vmatpush3.bf16.msra.mxu0 %v2385_v18  ;;  %v164_v29 = vsub.f32 %v2388_v19, %v163_v24  ;;  %v176_v30 = vand.u32 4294901760, %v175_v25  ;;  %v183_v31 = vand.u32 4294901760, %v182_v26  ;;  %v2425_v47 = vsub.f32 %v582_v42, %v2414_v44  ;;  %p2167_p8 = pnand %p2166_p7, %p2160_p4 }
  0x56   :  { %1924 = vmatprep.subr.bf16.mxu1 %v2265_v0  ;;  %1942 = vmatprep.subr.bf16.mxu0 %v2265_v0  ;;  %v190_v33 = vand.u32 4294901760, %v189_v27  ;;  %v197_v34 = vand.u32 4294901760, %v196_v28  ;;  %v1934_v48 = vpack.c.bf16 %v194_v17, %v187_v16  ;;  %v1149_v49 = vand.u32 4294901760, %v2420_v46 }
  0x57   :  { %v165_v36 = vand.u32 4294901760, %v164_v29  ;;  %v1925_v37 = vpack.c.bf16 %v183_v31, %v176_v30  ;;  %v655_v50 = vand.u32 4294901760, %v2425_v47 }
  0x58   :  { %1762 = vmatmul.mubr.f32.vlgmr.msra.gmra.mrb[0].mxu0 %v163_v24  ;;  %v1928_v41 = vpack.c.bf16 %v197_v34, %v190_v33  ;;  %v1150_v51 = vsub.f32 %v2420_v46, %v1149_v49 }
  0x59   :  { %1729 = vmatmul.mubr.f32.vlgmr.msra.gmra.mrb[0].mxu1 %v165_v36  ;;  %1944 = vmatpush3.bf16.msra.mxu0 %v2396_v32  ;;  %v656_v52 = vsub.f32 %v2425_v47, %v655_v50 }
  0x5a   :  { %1926 = vmatpush3.bf16.msra.mxu1 %v1925_v37  ;;  %1945 = vmatprep.subr.bf16.mxu0 %v2265_v0  ;;  %v1151_v53 = vand.u32 4294901760, %v1150_v51 }
  0x5b   :  { %1927 = vmatprep.subr.bf16.mxu1 %v2265_v0  ;;  %1739 = vmatprep.mubr.msk.f32.mxu1 %vm2266_vm0, %v2267_v1  ;;  %v657_v54 = vand.u32 4294901760, %v656_v52 }
  0x5c   :  { %1772 = vmatprep.mubr.msk.f32.mxu0 %vm2266_vm0, %v2267_v1 }
  0x5d   :  { %1947 = vmatpush3.bf16.msra.mxu0 %v2401_v39 }
  0x5e   :  { %1929 = vmatpush3.bf16.msra.mxu1 %v1928_v41  ;;  %1948 = vmatprep.subr.bf16.mxu0 %v2265_v0 }
  0x5f   :  { %1930 = vmatprep.subr.bf16.mxu1 %v2265_v0 }
  0x60   :  { %1773 = vmatmul.mubr.f32.vlgmr.msra.gmra.mrb[0].mxu0 %v2381_v13 }
  0x61   :  { %1740 = vmatmul.mubr.f32.vlgmr.msra.gmra.mrb[0].mxu1 %v2381_v13  ;;  %1950 = vmatpush3.bf16.msra.mxu0 %v2379_v12 }
  0x62   :  { %1932 = vmatpush3.bf16.msra.mxu1 %v1931_v45  ;;  %1951 = vmatprep.subr.bf16.mxu0 %v2265_v0 }
  0x63   :  { %1933 = vmatprep.subr.bf16.mxu1 %v2265_v0  ;;  %1750 = vmatprep.mubr.msk.f32.mxu1 %vm2266_vm0, %v2267_v1 }
  0x64   :  { %1783 = vmatprep.mubr.msk.f32.mxu0 %vm2266_vm0, %v2267_v1 }
  0x65   :  { %1953 = vmatpush3.bf16.msra.mxu0 %v2385_v18 }
  0x66   :  { %1935 = vmatpush3.bf16.msra.mxu1 %v1934_v48  ;;  %1990 = vmatprep.subr.bf16.mxu0 %v2265_v0 }
  0x67   :  { %1954 = vmatprep.subr.bf16.mxu1 %v2265_v0 }
  0x68   :  { %1784 = vmatmul.mubr.f32.vlgmr.msra.gmra.mrb[0].mxu0 %v2381_v13 }
  0x69   :  { %1751 = vmatmul.mubr.f32.vlgmr.msra.gmra.mrb[0].mxu1 %v2388_v19  ;;  %1992 = vmatpush3.bf16.msra.mxu0 %v2379_v12 }
  0x6a   :  { %1956 = vmatpush3.bf16.msra.mxu1 %v2379_v12  ;;  %1993 = vmatprep.subr.bf16.mxu0 %v2265_v0 }
  0x6b   :  { %1957 = vmatprep.subr.bf16.mxu1 %v2265_v0  ;;  %1794 = vmatprep.mubr.msk.f32.mxu1 %vm2266_vm0, %v2267_v1 }
  0x6c   :  { %1860 = vmatprep.mubr.msk.f32.mxu0 %vm2266_vm0, %v2267_v1 }
  0x6d   :  { %1995 = vmatpush3.bf16.msra.mxu0 %v2385_v18 }
  0x6e   :  { %1959 = vmatpush3.bf16.msra.mxu1 %v2385_v18  ;;  %1996 = vmatprep.subr.bf16.mxu0 %v2265_v0 }
  0x6f   :  { %1960 = vmatprep.subr.bf16.mxu1 %v2265_v0 }
  0x70   :  { %1861 = vmatmul.mubr.f32.vlgmr.msra.gmra.mrb[2].mxu0 %v1151_v53 }
  0x71   :  { %1795 = vmatmul.mubr.f32.vlgmr.msra.gmra.mrb[2].mxu1 %v657_v54  ;;  %1998 = vmatpush3.bf16.msra.mxu0 %v1925_v37 }
  0x72   :  { %1962 = vmatpush3.bf16.msra.mxu1 %v1925_v37  ;;  %1999 = vmatprep.subr.bf16.mxu0 %v2265_v0 }
  0x73   :  { %1963 = vmatprep.subr.bf16.mxu1 %v2265_v0  ;;  %1805 = vmatprep.mubr.msk.f32.mxu1 %vm2266_vm0, %v2267_v1 }
  0x74   :  { %1871 = vmatprep.mubr.msk.f32.mxu0 %vm2266_vm0, %v2267_v1 }
  0x75   :  { %2001 = vmatpush3.bf16.msra.mxu0 %v1928_v41 }
  0x76   :  { %1965 = vmatpush3.bf16.msra.mxu1 %v1928_v41  ;;  %2002 = vmatprep.subr.bf16.mxu0 %v2265_v0 }
  0x77   :  { %1966 = vmatprep.subr.bf16.mxu1 %v2265_v0 }
  0x78   :  { %1872 = vmatmul.mubr.f32.vlgmr.msra.gmra.mrb[2].mxu0 %v2411_v43 }
  0x79   :  { %1806 = vmatmul.mubr.f32.vlgmr.msra.gmra.mrb[2].mxu1 %v2414_v44  ;;  %2004 = vmatpush3.bf16.msra.mxu0 %v1931_v45 }
  0x7a   :  { %1968 = vmatpush3.bf16.msra.mxu1 %v1931_v45  ;;  %2005 = vmatprep.subr.bf16.mxu0 %v2265_v0 }
  0x7b   :  { %1969 = vmatprep.subr.bf16.mxu1 %v2265_v0  ;;  %1816 = vmatprep.mubr.msk.f32.mxu1 %vm2266_vm0, %v2267_v1 }
  0x7c   :  { %1882 = vmatprep.mubr.msk.f32.mxu0 %vm2266_vm0, %v2267_v1 }
  0x7d   :  { %2007 = vmatpush3.bf16.msra.mxu0 %v1934_v48 }
  0x7e   :  { %1971 = vmatpush3.bf16.msra.mxu1 %v1934_v48  ;;  %2008 = vmatprep.subr.bf16.mxu0 %v2265_v0 }
  0x7f   :  { %1972 = vmatprep.subr.bf16.mxu1 %v2265_v0 }
  0x80   :  { %1883 = vmatmul.mubr.f32.vlgmr.msra.gmra.mrb[2].mxu0 %v2420_v46 }
  0x81   :  { %1817 = vmatmul.mubr.f32.vlgmr.msra.gmra.mrb[2].mxu1 %v2425_v47  ;;  %2010 = vmatpush3.bf16.msra.mxu0 %v2379_v12 }
  0x82   :  { %1974 = vmatpush3.bf16.msra.mxu1 %v2379_v12  ;;  %2011 = vmatprep.subr.bf16.mxu0 %v2265_v0 }
  0x83   :  { %1975 = vmatprep.subr.bf16.mxu1 %v2265_v0  ;;  %1827 = vmatprep.mubr.msk.f32.mxu1 %vm2266_vm0, %v2267_v1 }
  0x84   :  { %1893 = vmatprep.mubr.msk.f32.mxu0 %vm2266_vm0, %v2267_v1 }
  0x85   :  { %2013 = vmatpush3.bf16.msra.mxu0 %v2385_v18 }
  0x86   :  { %1977 = vmatpush3.bf16.msra.mxu1 %v2385_v18  ;;  %2014 = vmatprep.subr.bf16.mxu0 %v2265_v0 }
  0x87   :  { %1978 = vmatprep.subr.bf16.mxu1 %v2265_v0 }
  0x88   :  { %1894 = vmatmul.mubr.f32.vlgmr.msra.gmra.mrb[2].mxu0 %v1149_v49 }
  0x89   :  { %1828 = vmatmul.mubr.f32.vlgmr.msra.gmra.mrb[2].mxu1 %v655_v50  ;;  %2016 = vmatpush3.bf16.msra.mxu0 %v2396_v32 }
  0x8a   :  { %1980 = vmatpush3.bf16.msra.mxu1 %v2396_v32  ;;  %2017 = vmatprep.subr.bf16.mxu0 %v2265_v0 }
  0x8b   :  { %1981 = vmatprep.subr.bf16.mxu1 %v2265_v0  ;;  %1838 = vmatprep.mubr.msk.f32.mxu1 %vm2266_vm0, %v2267_v1 }
  0x8c   :  { %1904 = vmatprep.mubr.msk.f32.mxu0 %vm2266_vm0, %v2267_v1 }
  0x8d   :  { %2019 = vmatpush3.bf16.msra.mxu0 %v2401_v39 }
  0x8e   :  { %1983 = vmatpush3.bf16.msra.mxu1 %v2401_v39  ;;  %2020 = vmatprep.subr.bf16.mxu0 %v2265_v0 }
  0x8f   :  { %1984 = vmatprep.subr.bf16.mxu1 %v2265_v0 }
  0x90   :  { %1905 = vmatmul.mubr.f32.vlgmr.msra.gmra.mrb[2].mxu0 %v2411_v43 }
  0x91   :  { %1839 = vmatmul.mubr.f32.vlgmr.msra.gmra.mrb[2].mxu1 %v2414_v44  ;;  %2022 = vmatpush3.bf16.msra.mxu0 %v2379_v12 }
  0x92   :  { %1986 = vmatpush3.bf16.msra.mxu1 %v2379_v12  ;;  %2023 = vmatprep.subr.bf16.mxu0 %v2265_v0 }
  0x93   :  { %1987 = vmatprep.subr.bf16.mxu1 %v2265_v0  ;;  %1849 = vmatprep.mubr.msk.f32.mxu1 %vm2266_vm0, %v2267_v1 }
  0x94   :  { %1915 = vmatprep.mubr.msk.f32.mxu0 %vm2266_vm0, %v2267_v1 }
  0x95   :  { %2025 = vmatpush3.bf16.msra.mxu0 %v2385_v18 }
  0x96   :  { %1989 = vmatpush3.bf16.msra.mxu1 %v2385_v18 }
  0x98   :  { %1916 = vmatmul.mubr.f32.vlgmr.msra.gmra.mrb[2].mxu0 %v2411_v43 }
  0x99   :  { %1850 = vmatmul.mubr.f32.vlgmr.msra.gmra.mrb[2].mxu1 %v2414_v44 }
 0x13b   :  { %v573_v56 = vpop.f32.mrb[0].mxu0 }
 0x13c   :  { %v338_v57 = vpop.f32.mrb[0].mxu1  ;;  %v1785_v58 = vpop.f32.mrb[1].mxu0 }
 0x13d   :  { %v2026_v59 = vadd.f32 %v1629_v55, %v338_v57  ;;  %v1752_v60 = vpop.f32.mrb[1].mxu1 }
 0x13f   :  { %v2027_v61 = vadd.f32 %v2026_v59, %v573_v56 }
 0x141   :  { %v577_v62 = vmax.f32 %v2027_v61, 0.0 }
 0x143   :  { %578 = vst [vmem:[#allocation11] sm:$0xff] %v577_v62 }
 0x144   :  { %2170 = shalt.err (!%p2167_p8)
}
 0x145   :  { %s2171_s13 = scalar_lea.hbm %s2575_s5, 128 }
 0x146   :  { %p2172_p9 = scmp.ne.s32.totalorder %s2575_s5, %s2171_s13  ;;  %p2175_p10 = scmp.lt.u32.totalorder %s2171_s13, %s2575_s5 }
 0x148   :  { %p2177_p11 = pnand %p2175_p10, %p2172_p9 }
 0x14a   :  { %2180 = shalt.err (!%p2177_p11)
}
 0x14b   :  { %1580 = dma.vmem_to_hbm [thread:$0]  %s1578_s10, 128, %s2575_s5, [#allocation5]  }
 0x14c   :  { %s2269_s18 = smov [#allocation12]   ;;  %s2270_s20 = smov [#allocation14]  }
 0x14d   :  { %s1587_s19 = sshll.u32 %s2269_s18, 4  ;;  %s1597_s21 = sshll.u32 %s2270_s20, 4  ;;  %s1588_s19 = int_to_ptr.vmem [resolvable:$true] %s1587_s19  ;;  %s2527_s21 = int_to_ptr.vmem [resolvable:$true] %s1597_s21 }
 0x14e   :  { %s2271_s22 = smov [#allocation15]   ;;  %s2181_s23 = scalar_lea.vmem %s1588_s19, 128 }
 0x14f   :  { %s1607_s5 = sshll.u32 %s2271_s22, 4  ;;  %p2182_p12 = scmp.ne.s32.totalorder %s1588_s19, %s2181_s23  ;;  %s1608_s5 = int_to_ptr.vmem [resolvable:$true] %s1607_s5 }
 0x150   :  { %p2186_p13 = scmp.lt.s32.totalorder %s1588_s19, %s1588_s19  ;;  %p2187_p0 = scmp.lt.s32.totalorder %s2181_s23, %s2181_s23 }
 0x152   :  { %p2188_p1 = por %p2187_p0, %p2186_p13 }
 0x154   :  { %p2189_p2 = pnand %p2188_p1, %p2182_p12 }
 0x16b   :  { %v1559_v63 = vpop.f32.mrb[2].mxu0 }
 0x16c   :  { %v1065_v0 = vpop.f32.mrb[2].mxu1  ;;  %v2029_v1 = vadd.f32 %v1629_v55, %v1559_v63  ;;  %v1917_v2 = vpop.f32.mrb[3].mxu0 }
 0x16d   :  { %v2028_v3 = vadd.f32 %v1629_v55, %v1065_v0  ;;  %v1851_v4 = vpop.f32.mrb[3].mxu1 }
 0x16e   :  { %v1563_v5 = vmax.f32 %v2029_v1, 0.0 }
 0x16f   :  { %v1069_v6 = vmax.f32 %v2028_v3, 0.0 }
 0x170   :  { %1564 = vst [vmem:[#allocation14] sm:$0xff] %v1563_v5 }
 0x171   :  { %v1072_v7 = vadd.f32 %v1069_v6, %v577_v62  ;;  %1070 = vst [vmem:[#allocation12] sm:$0xff] %v1069_v6 }
 0x172   :  { %2192 = shalt.err (!%p2189_p2)
}
 0x173   :  { %s2193_s26 = scalar_lea.hbm %s2576_s6, 128 }
 0x174   :  { %p2194_p3 = scmp.ne.s32.totalorder %s2576_s6, %s2193_s26  ;;  %p2197_p4 = scmp.lt.u32.totalorder %s2193_s26, %s2576_s6 }
 0x176   :  { %p2199_p5 = pnand %p2197_p4, %p2194_p3 }
 0x178   :  { %2202 = shalt.err (!%p2199_p5)
}
 0x179   :  { %1590 = dma.vmem_to_hbm [thread:$0]  %s1588_s19, 128, %s2576_s6, [#allocation13]   ;;  %v1566_v8 = vadd.f32 %v1563_v5, %v1072_v7 }
 0x17a   :  { %s2203_s9 = scalar_lea.vmem %s2527_s21, 128  ;;  %p2208_p7 = scmp.lt.s32.totalorder %s2527_s21, %s2527_s21 }
 0x17b   :  { %p2204_p6 = scmp.ne.s32.totalorder %s2527_s21, %s2203_s9  ;;  %p2209_p8 = scmp.lt.s32.totalorder %s2203_s9, %s2203_s9 }
 0x17d   :  { %p2210_p9 = por %p2209_p8, %p2208_p7 }
 0x17f   :  { %p2211_p10 = pnand %p2210_p9, %p2204_p6 }
 0x181   :  { %2214 = shalt.err (!%p2211_p10)
}
 0x182   :  { %s2215_s12 = scalar_lea.hbm %s2577_s7, 128 }
 0x183   :  { %p2216_p11 = scmp.ne.s32.totalorder %s2577_s7, %s2215_s12  ;;  %p2219_p12 = scmp.lt.u32.totalorder %s2215_s12, %s2577_s7 }
 0x185   :  { %p2221_p13 = pnand %p2219_p12, %p2216_p11 }
 0x187   :  { %2224 = shalt.err (!%p2221_p13)
}
 0x188   :  { %1600 = dma.vmem_to_hbm [thread:$0]  %s2527_s21, 128, %s2577_s7, [#allocation13]   ;;  %v1569_v9 = vmul.f32 0.33333334, %v1566_v8 }
 0x189   :  { %s2225_s17 = scalar_lea.vmem %s1608_s5, 128  ;;  %p2230_p1 = scmp.lt.s32.totalorder %s1608_s5, %s1608_s5 }
 0x18a   :  { %1570 = vst [vmem:[#allocation15] sm:$0xff] %v1569_v9  ;;  %p2226_p0 = scmp.ne.s32.totalorder %s1608_s5, %s2225_s17  ;;  %p2231_p2 = scmp.lt.s32.totalorder %s2225_s17, %s2225_s17 }
 0x18c   :  { %p2232_p3 = por %p2231_p2, %p2230_p1 }
 0x18e   :  { %p2233_p4 = pnand %p2232_p3, %p2226_p0 }
 0x190   :  { %2236 = shalt.err (!%p2233_p4)
}
 0x191   :  { %s2237_s18 = scalar_lea.hbm %s2578_s8, 128 }
 0x192   :  { %p2238_p5 = scmp.ne.s32.totalorder %s2578_s8, %s2237_s18  ;;  %p2241_p6 = scmp.lt.u32.totalorder %s2237_s18, %s2578_s8 }
 0x194   :  { %p2243_p7 = pnand %p2241_p6, %p2238_p5 }
 0x196   :  { %2246 = shalt.err (!%p2243_p7)
}
 0x197   :  { %1610 = dma.vmem_to_hbm [thread:$0]  %s1608_s5, 128, %s2578_s8, [#allocation16]  }
 0x198   :  { %2253 = dma.done.wait [#allocation5], 128  }
 0x199   :  { %2254 = vsyncadd [#allocation5], 4294967168 }
 0x19a   :  { %2255 = dma.done.wait [#allocation13], 256  }
 0x19b   :  { %2256 = vsyncadd [#allocation13], 4294967040 }
 0x19c   :  { %2257 = dma.done.wait [#allocation16], 128  }
 0x19d   :  { %2258 = vsyncadd [#allocation16], 4294967168 }
 0x19e   :  { %1623 = vsyncpa [#allocation4], 1 }
 0x19f   :  { %1624 = vsyncpa [#allocation7], 1 }
 0x1a0   :  { %1625 = vsyncpa [#allocation10], 1 }
 0x1a1   :  { %1626 = vsyncpa [#allocation5], 1 }
 0x1a2   :  { %1627 = vsyncpa [#allocation13], 1 }
 0x1a3   :  { %1628 = vsyncpa [#allocation16], 1 }

</bundles_post_ra>
